<compile_context>
chip_gen: v6e
topology: v6e:2x2x1
jax: 0.10.0
libtpu: 0.0.40
codegen_flags: <defaults>
</compile_context>

<pallas_src>
import functools

import jax
import jax.numpy as jnp
from jax.experimental import pallas as pl
from jax.experimental.pallas import tpu as pltpu


def _round_up(x, m):
    return ((x + m - 1) // m) * m


def _self_corr_kernel(x_ref, w1t_ref, b1_ref, w2t_ref, b2_ref, o_ref, *, dim):
    """One lane-dense row-tile.

    x_ref  : (D, TL)     point features, points on the lane axis
    w1t_ref: (H, D)      first Linear weight, pre-transposed
    b1_ref : (H, 1)      first Linear bias (broadcast along lanes)
    w2t_ref: (DD, H)     second Linear weight, pre-transposed, lr folded in
    b2_ref : (DD, 1)     second Linear bias, lr folded in
    o_ref  : (D, TL)     output features
    """
    x = x_ref[...].astype(jnp.float32)                                   # (D, TL)

    # MLP: Linear -> ReLU -> Linear  (MXU matmuls, f32 accumulation, lane-dense N)
    h1 = jnp.dot(w1t_ref[...], x, preferred_element_type=jnp.float32)
    h1 = jnp.maximum(h1 + b1_ref[...].astype(jnp.float32), 0.0)          # (H, TL)
    h2 = jnp.dot(w2t_ref[...], h1, preferred_element_type=jnp.float32)
    h2 = h2 + b2_ref[...].astype(jnp.float32)                            # (DD, TL)
    # h2[d*D + k, l] = lr * W_l[d, k]   (lr folded into w2t/b2 by the wrapper)

    # per-point bmm: out[k, l] = sum_d x[d, l] * h2[d*D + k, l]
    # Unrolled over d: static sublane slices, full-width VPU FMAs. No zero init.
    acc = x[0:1, :] * h2[0:dim, :]                                       # (D, TL)
    for d in range(1, dim):
        acc = acc + x[d:d + 1, :] * h2[d * dim:(d + 1) * dim, :]

    o_ref[...] = acc.astype(o_ref.dtype)


def self_correlation_stack(x, w1, b1, w2, b2, *, learning_rate=1.0, tile_l=None):
    """x: (S, N, I, D); shared MLP params w1:(D,H) b1:(1,H)|(H,) w2:(H,D*D) b2:(1,D*D)|(D*D,)."""
    S, N, I, D = x.shape
    H = w1.shape[-1]
    DD = w2.shape[-1]
    assert w1.shape[-2] == D and DD == D * D, "mlp must map D -> D*D for SelfCorrelation"

    L_total = S * N * I

    # Lane-dense tiling: TL multiple of 128, default 512, never bigger than needed.
    if tile_l is None:
        tile_l = 512
    tile_l = max(128, (min(int(tile_l), _round_up(L_total, 128)) // 128) * 128)
    Lp = _round_up(L_total, tile_l)

    # Layout plumbing: points on the lane axis, zero-pad to the tile boundary.
    # (Padded columns produce out == 0 since out = x @ W and x == 0 there.)
    xf = x.reshape(L_total, D).T                                         # (D, L_total)
    if Lp != L_total:
        xf = jnp.pad(xf, ((0, 0), (0, Lp - L_total)))

    # Single shared parameter set (deepcopy => identical across the stack);
    # pre-transpose for the (param @ activations) orientation and fold lr into
    # the second Linear:  lr * (x @ reshape(h1@W2 + b2)) == x @ reshape(h1@(lr*W2) + lr*b2).
    lr = float(learning_rate)
    w1t = w1.T                                                           # (H, D)
    b1c = b1.reshape(H, 1)                                               # (H, 1)
    w2t = (lr * w2).T                                                    # (DD, H)
    b2c = (lr * b2).reshape(DD, 1)                                       # (DD, 1)

    kernel = functools.partial(_self_corr_kernel, dim=D)

    out = pl.pallas_call(
        kernel,
        out_shape=jax.ShapeDtypeStruct((D, Lp), x.dtype),
        grid_spec=pltpu.PrefetchScalarGridSpec(
            num_scalar_prefetch=0,
            grid=(Lp // tile_l,),
            in_specs=[
                pl.BlockSpec((D, tile_l), lambda r: (0, r)),   # x tile (lane-dense)
                pl.BlockSpec((H, D),      lambda r: (0, 0)),   # W1^T  (VMEM-resident)
                pl.BlockSpec((H, 1),      lambda r: (0, 0)),   # b1
                pl.BlockSpec((DD, H),     lambda r: (0, 0)),   # lr*W2^T
                pl.BlockSpec((DD, 1),     lambda r: (0, 0)),   # lr*b2
            ],
            out_specs=pl.BlockSpec((D, tile_l), lambda r: (0, r)),
        ),
        compiler_params=pltpu.CompilerParams(
            dimension_semantics=("parallel",)),
    )(xf, w1t, b1c, w2t, b2c)

    return out[:, :L_total].T.reshape(S, N, I, D)


def _reference(x, w1, b1, w2, b2, lr):
    """Pure-JAX reference of the PyTorch forward (for correctness check)."""
    S, N, I, D = x.shape
    xf = x.reshape(S * N * I, D)
    h1 = jnp.maximum(xf @ w1 + b1.reshape(1, -1), 0.0)
    h2 = h1 @ w2 + b2.reshape(1, -1)
    W = h2.reshape(-1, D, D)
    out = lr * jnp.einsum('ld,ldk->lk', xf, W)
    return out.reshape(S, N, I, D)


if __name__ == "__main__":
    # Small deterministic shapes: stack_size=2, batch=2, members=16, feature dim=8, hidden=32
    S, N, I, D, H = 2, 2, 16, 8, 32
    learning_rate = 1.0

    key = jax.random.PRNGKey(0)
    kx, k1, k2, k3, k4, kx2 = jax.random.split(key, 6)

    x = jax.random.normal(kx, (S, N, I, D), dtype=jnp.float32)

    # One deterministic MLP parameter set; copy.deepcopy(mlp) => identical across stack.
    w1 = 0.1 * jax.random.normal(k1, (D, H), dtype=jnp.float32)
    b1 = 0.1 * jax.random.normal(k2, (1, H), dtype=jnp.float32)
    w2 = 0.1 * jax.random.normal(k3, (H, D * D), dtype=jnp.float32)
    b2 = 0.1 * jax.random.normal(k4, (1, D * D), dtype=jnp.float32)

    # Small case (exercises padding: 64 points -> one 128-lane tile).
    out = self_correlation_stack(x, w1, b1, w2, b2, learning_rate=learning_rate)
    out = jax.block_until_ready(out)
    ref = _reference(x, w1, b1, w2, b2, learning_rate)
    assert out.shape == (S, N, I, D)
    assert jnp.allclose(out, ref, atol=1e-4, rtol=1e-4), "Pallas kernel mismatch vs reference"

    # Multi-tile case (exercises the grid: 2*4*256 = 2048 points, tile_l=512 -> 4 tiles).
    S2, N2, I2 = 2, 4, 256
    x2 = jax.random.normal(kx2, (S2, N2, I2, D), dtype=jnp.float32)
    out2 = jax.block_until_ready(
        self_correlation_stack(x2, w1, b1, w2, b2,
                               learning_rate=learning_rate, tile_l=512))
    ref2 = _reference(x2, w1, b1, w2, b2, learning_rate)
    assert out2.shape == (S2, N2, I2, D)
    assert jnp.allclose(out2, ref2, atol=1e-4, rtol=1e-4), "Pallas kernel mismatch vs reference (tiled)"

    print("KERNEL_OK")
</pallas_src>

<mosaic_0001>
module attributes {stable_mosaic.version = 11 : i64} {
  func.func @_self_corr_kernel(%arg0: i32, %arg1: memref<8x128xf32, #tpu.memory_space<vmem>>, %arg2: memref<32x8xf32, #tpu.memory_space<vmem>>, %arg3: memref<32x1xf32, #tpu.memory_space<vmem>>, %arg4: memref<64x32xf32, #tpu.memory_space<vmem>>, %arg5: memref<64x1xf32, #tpu.memory_space<vmem>>, %arg6: memref<8x128xf32, #tpu.memory_space<vmem>>) attributes {dimension_semantics = [#tpu.dimension_semantics<parallel>], iteration_bounds = array<i64: 1>, scalar_prefetch = 0 : i64, scratch_operands = 0 : i64, tpu.core_type = #tpu.core_type<tc>, window_params = [{transform_indices = @transform_0, window_bounds = array<i64: 8, 128>}, {pipeline_mode = #tpu.pipeline_mode<synchronous>, transform_indices = @transform_1, window_bounds = array<i64: 32, 8>}, {pipeline_mode = #tpu.pipeline_mode<synchronous>, transform_indices = @transform_2, window_bounds = array<i64: 32, 1>}, {pipeline_mode = #tpu.pipeline_mode<synchronous>, transform_indices = @transform_3, window_bounds = array<i64: 64, 32>}, {pipeline_mode = #tpu.pipeline_mode<synchronous>, transform_indices = @transform_4, window_bounds = array<i64: 64, 1>}, {transform_indices = @transform_5, window_bounds = array<i64: 8, 128>}]} {
    %c0 = arith.constant 0 : index
    %c0_0 = arith.constant 0 : index
    %0 = vector.load %arg1[%c0, %c0_0] : memref<8x128xf32, #tpu.memory_space<vmem>>, vector<8x128xf32>
    %c0_1 = arith.constant 0 : index
    %c0_2 = arith.constant 0 : index
    %1 = vector.load %arg2[%c0_1, %c0_2] : memref<32x8xf32, #tpu.memory_space<vmem>>, vector<32x8xf32>
    %cst = arith.constant dense<0.000000e+00> : vector<32x128xf32>
    %2 = tpu.matmul %1, %0, %cst {dimension_numbers = #tpu.dot_dimension_numbers<[1], [0], [0], [1], [0, 0, 1, 1], [], []>} : vector<32x8xf32>, vector<8x128xf32>, vector<32x128xf32> -> vector<32x128xf32>
    %c0_3 = arith.constant 0 : index
    %c0_4 = arith.constant 0 : index
    %3 = vector.load %arg3[%c0_3, %c0_4] : memref<32x1xf32, #tpu.memory_space<vmem>>, vector<32x1xf32>
    %4 = vector.broadcast %3 : vector<32x1xf32> to vector<32x128xf32>
    %5 = arith.addf %2, %4 : vector<32x128xf32>
    %cst_5 = arith.constant 0.000000e+00 : f32
    %6 = vector.broadcast %cst_5 : f32 to vector<32x128xf32>
    %7 = arith.maximumf %5, %6 : vector<32x128xf32>
    %c0_6 = arith.constant 0 : index
    %c0_7 = arith.constant 0 : index
    %8 = vector.load %arg4[%c0_6, %c0_7] : memref<64x32xf32, #tpu.memory_space<vmem>>, vector<64x32xf32>
    %cst_8 = arith.constant dense<0.000000e+00> : vector<64x128xf32>
    %9 = tpu.matmul %8, %7, %cst_8 {dimension_numbers = #tpu.dot_dimension_numbers<[1], [0], [0], [1], [0, 0, 1, 1], [], []>} : vector<64x32xf32>, vector<32x128xf32>, vector<64x128xf32> -> vector<64x128xf32>
    %c0_9 = arith.constant 0 : index
    %c0_10 = arith.constant 0 : index
    %10 = vector.load %arg5[%c0_9, %c0_10] : memref<64x1xf32, #tpu.memory_space<vmem>>, vector<64x1xf32>
    %11 = vector.broadcast %10 : vector<64x1xf32> to vector<64x128xf32>
    %12 = arith.addf %9, %11 : vector<64x128xf32>
    %13 = vector.extract_strided_slice %0 {offsets = [0, 0], sizes = [1, 128], strides = [1, 1]} : vector<8x128xf32> to vector<1x128xf32>
    %14 = vector.extract_strided_slice %12 {offsets = [0, 0], sizes = [8, 128], strides = [1, 1]} : vector<64x128xf32> to vector<8x128xf32>
    %15 = vector.broadcast %13 : vector<1x128xf32> to vector<8x128xf32>
    %16 = arith.mulf %15, %14 : vector<8x128xf32>
    %17 = vector.extract_strided_slice %0 {offsets = [1, 0], sizes = [1, 128], strides = [1, 1]} : vector<8x128xf32> to vector<1x128xf32>
    %18 = vector.extract_strided_slice %12 {offsets = [8, 0], sizes = [8, 128], strides = [1, 1]} : vector<64x128xf32> to vector<8x128xf32>
    %19 = vector.broadcast %17 : vector<1x128xf32> to vector<8x128xf32>
    %20 = arith.mulf %19, %18 : vector<8x128xf32>
    %21 = arith.addf %16, %20 : vector<8x128xf32>
    %22 = vector.extract_strided_slice %0 {offsets = [2, 0], sizes = [1, 128], strides = [1, 1]} : vector<8x128xf32> to vector<1x128xf32>
    %23 = vector.extract_strided_slice %12 {offsets = [16, 0], sizes = [8, 128], strides = [1, 1]} : vector<64x128xf32> to vector<8x128xf32>
    %24 = vector.broadcast %22 : vector<1x128xf32> to vector<8x128xf32>
    %25 = arith.mulf %24, %23 : vector<8x128xf32>
    %26 = arith.addf %21, %25 : vector<8x128xf32>
    %27 = vector.extract_strided_slice %0 {offsets = [3, 0], sizes = [1, 128], strides = [1, 1]} : vector<8x128xf32> to vector<1x128xf32>
    %28 = vector.extract_strided_slice %12 {offsets = [24, 0], sizes = [8, 128], strides = [1, 1]} : vector<64x128xf32> to vector<8x128xf32>
    %29 = vector.broadcast %27 : vector<1x128xf32> to vector<8x128xf32>
    %30 = arith.mulf %29, %28 : vector<8x128xf32>
    %31 = arith.addf %26, %30 : vector<8x128xf32>
    %32 = vector.extract_strided_slice %0 {offsets = [4, 0], sizes = [1, 128], strides = [1, 1]} : vector<8x128xf32> to vector<1x128xf32>
    %33 = vector.extract_strided_slice %12 {offsets = [32, 0], sizes = [8, 128], strides = [1, 1]} : vector<64x128xf32> to vector<8x128xf32>
    %34 = vector.broadcast %32 : vector<1x128xf32> to vector<8x128xf32>
    %35 = arith.mulf %34, %33 : vector<8x128xf32>
    %36 = arith.addf %31, %35 : vector<8x128xf32>
    %37 = vector.extract_strided_slice %0 {offsets = [5, 0], sizes = [1, 128], strides = [1, 1]} : vector<8x128xf32> to vector<1x128xf32>
    %38 = vector.extract_strided_slice %12 {offsets = [40, 0], sizes = [8, 128], strides = [1, 1]} : vector<64x128xf32> to vector<8x128xf32>
    %39 = vector.broadcast %37 : vector<1x128xf32> to vector<8x128xf32>
    %40 = arith.mulf %39, %38 : vector<8x128xf32>
    %41 = arith.addf %36, %40 : vector<8x128xf32>
    %42 = vector.extract_strided_slice %0 {offsets = [6, 0], sizes = [1, 128], strides = [1, 1]} : vector<8x128xf32> to vector<1x128xf32>
    %43 = vector.extract_strided_slice %12 {offsets = [48, 0], sizes = [8, 128], strides = [1, 1]} : vector<64x128xf32> to vector<8x128xf32>
    %44 = vector.broadcast %42 : vector<1x128xf32> to vector<8x128xf32>
    %45 = arith.mulf %44, %43 : vector<8x128xf32>
    %46 = arith.addf %41, %45 : vector<8x128xf32>
    %47 = vector.extract_strided_slice %0 {offsets = [7, 0], sizes = [1, 128], strides = [1, 1]} : vector<8x128xf32> to vector<1x128xf32>
    %48 = vector.extract_strided_slice %12 {offsets = [56, 0], sizes = [8, 128], strides = [1, 1]} : vector<64x128xf32> to vector<8x128xf32>
    %49 = vector.broadcast %47 : vector<1x128xf32> to vector<8x128xf32>
    %50 = arith.mulf %49, %48 : vector<8x128xf32>
    %51 = arith.addf %46, %50 : vector<8x128xf32>
    %c0_11 = arith.constant 0 : index
    %c0_12 = arith.constant 0 : index
    %52 = vector.load %arg6[%c0_11, %c0_12] : memref<8x128xf32, #tpu.memory_space<vmem>>, vector<8x128xf32>
    tpu.vector_store %arg6[%c0_11, %c0_12], %51 {strides = array<i32>} : memref<8x128xf32, #tpu.memory_space<vmem>>, vector<8x128xf32>,
    return
  }
  func.func @transform_0(%arg0: i32) -> (i32, i32) {
    %c0_i32 = arith.constant 0 : i32
    %c0_i32_0 = arith.constant 0 : i32
    return %c0_i32, %arg0 : i32, i32
  }
  func.func @transform_1(%arg0: i32) -> (i32, i32) {
    %c0_i32 = arith.constant 0 : i32
    %c0_i32_0 = arith.constant 0 : i32
    %c0_i32_1 = arith.constant 0 : i32
    return %c0_i32, %c0_i32_0 : i32, i32
  }
  func.func @transform_2(%arg0: i32) -> (i32, i32) {
    %c0_i32 = arith.constant 0 : i32
    %c0_i32_0 = arith.constant 0 : i32
    %c0_i32_1 = arith.constant 0 : i32
    return %c0_i32, %c0_i32_0 : i32, i32
  }
  func.func @transform_3(%arg0: i32) -> (i32, i32) {
    %c0_i32 = arith.constant 0 : i32
    %c0_i32_0 = arith.constant 0 : i32
    %c0_i32_1 = arith.constant 0 : i32
    return %c0_i32, %c0_i32_0 : i32, i32
  }
  func.func @transform_4(%arg0: i32) -> (i32, i32) {
    %c0_i32 = arith.constant 0 : i32
    %c0_i32_0 = arith.constant 0 : i32
    %c0_i32_1 = arith.constant 0 : i32
    return %c0_i32, %c0_i32_0 : i32, i32
  }
  func.func @transform_5(%arg0: i32) -> (i32, i32) {
    %c0_i32 = arith.constant 0 : i32
    %c0_i32_0 = arith.constant 0 : i32
    return %c0_i32, %arg0 : i32, i32
  }
}

</mosaic_0001>

<bundles_post_ra>
// kernel: tpu_custom_call.1
= control target key start
LH: loop header
LB: loop body
LE: loop exit
PB: predicated region body
PF: predicated region fallthrough
CT: control target
= control target key end

     0   :  { %vm50_vm0 = vcmask 64512   ;;  %v491_v5 = vmov 0   ;;  %s625_s0 = inlined_call_operand.vmem [shape: f32[8,128], index: 0, kind: input, shape index: {}]   ;;  %s626_s1 = inlined_call_operand.vmem [shape: f32[32,8], index: 1, kind: input, shape index: {}]   ;;  %s627_s2 = inlined_call_operand.vmem [shape: f32[32,1], index: 2, kind: input, shape index: {}]   ;;  %s628_s3 = inlined_call_operand.vmem [shape: f32[64,32], index: 3, kind: input, shape index: {}]   ;;  %s629_s4 = inlined_call_operand.vmem [shape: f32[64,1], index: 4, kind: input, shape index: {}]   ;;  %s630_s5 = inlined_call_operand.hbm [shape: f32[8,128], index: 5, kind: output, shape index: {}]  }
   0x1   :  { %v526_v0 = vld [vmem:[%s625_s0] sm:$0xff]  ;;  %v23_v2 = vld [vmem:[%s626_s1 + $0x8] sm:$0xff]  ;;  %v24_v3 = vld [vmem:[%s626_s1 + $0x10] sm:$0xff]  ;;  %467 = vset.pattern.permute.xlu0 %v491_v5  ;;  %468 = vset.pattern.permute.xlu1 %v491_v5 }
   0x2   :  { %v22_v1 = vld [vmem:[%s626_s1] sm:$0xff]  ;;  %429 = vmatprep.subr.mxu0 %v526_v0  ;;  %v29_v4 = vld [vmem:[%s627_s2 + $0x18] sm:$0xff]  ;;  %v27_v6 = vld [vmem:[%s627_s2 + $0x8] sm:$0xff] }
   0x3   :  { %431 = vmatprep.mubr.msk.f32.mxu0 %vm50_vm0, %v22_v1  ;;  %430 = vmatpush3.msra.mxu0 %v526_v0  ;;  %v25_v7 = vld [vmem:[%s626_s1 + $0x18] sm:$0xff]  ;;  %v28_v8 = vld [vmem:[%s627_s2 + $0x10] sm:$0xff] }
   0x4   :  { %432 = vmatmul.mubr.msk.f32.vlgmr.msra.gmra.mxu0 %vm50_vm0, %v23_v2  ;;  %47 = vperm.xlu0 %467, %v29_v4  }
   0x5   :  { %434 = vmatprep.mubr.msk.f32.mxu0 %vm50_vm0, %v24_v3  ;;  %37 = vperm.xlu1 %468, %v27_v6  }
   0x6   :  { %10 = vsyncpa [#allocation3], 0  ;;  %v26_v9 = vld [vmem:[%s627_s2] sm:$0xff]  ;;  %v161_v11 = vld [vmem:[%s629_s4 + $0x8] sm:$0xff]  ;;  %vm208_vm1 = vcmask 261120   ;;  %v338_v42 = vlaneseq }
   0x7   :  { %v160_v10 = vld [vmem:[%s629_s4] sm:$0xff]  ;;  %v162_v12 = vld [vmem:[%s629_s4 + $0x10] sm:$0xff]  ;;  %v163_v13 = vld [vmem:[%s629_s4 + $0x18] sm:$0xff] }
   0x8   :  { %435 = vmatmul.mubr.msk.f32.gmra.mxu0 %vm50_vm0, %v25_v7  ;;  %42 = vperm.xlu0 %467, %v28_v8   ;;  %v164_v14 = vld [vmem:[%s629_s4 + $0x20] sm:$0xff]  ;;  %v165_v15 = vld [vmem:[%s629_s4 + $0x28] sm:$0xff]  ;;  %v166_v16 = vld [vmem:[%s629_s4 + $0x30] sm:$0xff]  ;;  %v339_v45 = vshrl.u32 %v338_v42, 7 }
   0x9   :  { %32 = vperm.xlu1 %468, %v26_v9   ;;  %v167_v17 = vld [vmem:[%s629_s4 + $0x38] sm:$0xff]  ;;  %v152_v18 = vld [vmem:[%s628_s3] sm:$0xff]  ;;  %v154_v19 = vld [vmem:[%s628_s3 + $0x10] sm:$0xff] }
   0xa   :  { %445 = vmatprep.mubr.msk.f32.mxu0 %vm208_vm1, %v152_v18  ;;  %448 = vmatprep.mubr.msk.f32.mxu1 %vm208_vm1, %v154_v19  ;;  %v153_v36 = vld [vmem:[%s628_s3 + $0x8] sm:$0xff]  ;;  %v155_v37 = vld [vmem:[%s628_s3 + $0x18] sm:$0xff]  ;;  %v156_v38 = vld [vmem:[%s628_s3 + $0x20] sm:$0xff]  ;;  %v345_v46 = vsub.s32 1, %v339_v45  ;;  %v340_v47 = vsub.s32 0, %v339_v45  ;;  %v351_v50 = vsub.s32 2, %v339_v45 }
   0xb   :  { %v157_v39 = vld [vmem:[%s628_s3 + $0x28] sm:$0xff]  ;;  %v158_v40 = vld [vmem:[%s628_s3 + $0x30] sm:$0xff]  ;;  %v159_v41 = vld [vmem:[%s628_s3 + $0x38] sm:$0xff]  ;;  %v357_v55 = vsub.s32 3, %v339_v45  ;;  %v363_v59 = vsub.s32 4, %v339_v45  ;;  %v369_v2 = vsub.s32 5, %v339_v45 }
   0xc   :  { %170 = vperm.xlu0 %467, %v160_v10   ;;  %v346_v54 = vrot.slane %v526_v0, %v345_v46  ;;  %v341_v56 = vrot.slane %v526_v0, %v340_v47  ;;  %v352_v62 = vrot.slane %v526_v0, %v351_v50  ;;  %v381_v19 = vsub.s32 7, %v339_v45  ;;  %s492_s3 = smov [#allocation2]  }
   0xd   :  { %175 = vperm.xlu1 %468, %v161_v11   ;;  %v358_v5 = vrot.slane %v526_v0, %v357_v55  ;;  %v364_v9 = vrot.slane %v526_v0, %v363_v59  ;;  %s392_s12 = sshll.u32 %s492_s3, 4  ;;  %s393_s12 = int_to_ptr.vmem [resolvable:$true] %s392_s12 }
   0xe   :  { %s469_s13 = scalar_lea.vmem %s393_s12, 128  ;;  %p474_p1 = scmp.lt.s32.totalorder %s393_s12, %s393_s12 }
   0xf   :  { %p470_p0 = scmp.ne.s32.totalorder %s393_s12, %s469_s13  ;;  %p475_p2 = scmp.lt.s32.totalorder %s469_s13, %s469_s13 }
  0x10   :  { %180 = vperm.xlu0 %467, %v162_v12  }
  0x11   :  { %185 = vperm.xlu1 %468, %v163_v13   ;;  %v375_v13 = vsub.s32 6, %v339_v45  ;;  %p476_p3 = por %p475_p2, %p474_p1 }
  0x13   :  { %p477_p4 = pnand %p476_p3, %p470_p0 }
  0x14   :  { %190 = vperm.xlu0 %467, %v164_v14   ;;  %v370_v14 = vrot.slane %v526_v0, %v369_v2 }
  0x15   :  { %195 = vperm.xlu1 %468, %v165_v15  }
  0x18   :  { %200 = vperm.xlu0 %467, %v166_v16  }
  0x19   :  { %205 = vperm.xlu1 %468, %v167_v17  }
  0x7f   :  { %v48_v20 = vpop.permute.xlu0 %47 }
  0x80   :  { %v38_v22 = vpop.permute.xlu1 %37 }
  0x83   :  { %v43_v26 = vpop.permute.xlu0 %42 }
  0x84   :  { %v33_v31 = vpop.permute.xlu1 %32 }
  0x87   :  { %v171_v43 = vpop.permute.xlu0 %170 }
  0x88   :  { %v176_v44 = vpop.permute.xlu1 %175 }
  0x8b   :  { %v181_v48 = vpop.permute.xlu0 %180 }
  0x8c   :  { %v186_v49 = vpop.permute.xlu1 %185 }
  0x8f   :  { %v191_v63 = vpop.permute.xlu0 %190 }
  0x90   :  { %v196_v7 = vpop.permute.xlu1 %195 }
  0xc4   :  { %v433_v21 = vpop.f32.mrf.mxu0 }
  0xc5   :  { %v135_v28 = vadd.f32 %v433_v21, %v38_v22 }
  0xc6   :  { %v129_v23 = vpop.f32.mrf.mxu0 }
  0xc7   :  { %v130_v32 = vadd.f32 %v129_v23, %v33_v31  ;;  %v149_v34 = vmax.f32 %v135_v28, 0.0 }
  0xc8   :  { %v436_v24 = vpop.f32.mrf.mxu0 }
  0xc9   :  { %v145_v25 = vadd.f32 %v436_v24, %v48_v20  ;;  %v148_v35 = vmax.f32 %v130_v32, 0.0  ;;  %v201_v20 = vpop.permute.xlu0 %200 }
  0xca   :  { %v139_v27 = vpop.f32.mrf.mxu0 }
  0xcb   :  { %v151_v29 = vmax.f32 %v145_v25, 0.0  ;;  %v140_v30 = vadd.f32 %v139_v27, %v43_v26  ;;  %v376_v25 = vrot.slane %v526_v0, %v375_v13  ;;  %v206_v26 = vpop.permute.xlu1 %205 }
  0xcd   :  { %v150_v33 = vmax.f32 %v140_v30, 0.0  ;;  %437 = vmatprep.subr.mxu0 %v151_v29  ;;  %457 = vmatprep.subr.mxu1 %v151_v29  ;;  %v382_v30 = vrot.slane %v526_v0, %v381_v19 }
  0xce   :  { %438 = vmatpush3.msra.mxu0 %v151_v29  ;;  %461 = vmatpush3.msra.mxu1 %v151_v29 }
  0xcf   :  { %439 = vmatprep.subr.mxu0 %v150_v33  ;;  %458 = vmatprep.subr.mxu1 %v150_v33 }
  0xd0   :  { %440 = vmatpush3.msra.mxu0 %v150_v33  ;;  %462 = vmatpush3.msra.mxu1 %v150_v33 }
  0xd1   :  { %441 = vmatprep.subr.mxu0 %v149_v34  ;;  %459 = vmatprep.subr.mxu1 %v149_v34 }
  0xd2   :  { %442 = vmatpush3.msra.mxu0 %v149_v34  ;;  %463 = vmatpush3.msra.mxu1 %v149_v34 }
  0xd3   :  { %443 = vmatprep.subr.mxu0 %v148_v35  ;;  %460 = vmatprep.subr.mxu1 %v148_v35 }
  0xd4   :  { %444 = vmatpush3.msra.mxu0 %v148_v35  ;;  %464 = vmatpush3.msra.mxu1 %v148_v35 }
  0xd5   :  { %446 = vmatmul.mubr.msk.f32.vlgmr.msra.gmra.mxu0 %vm208_vm1, %v153_v36  ;;  %449 = vmatmul.mubr.msk.f32.vlgmr.msra.gmra.mxu1 %vm208_vm1, %v155_v37 }
  0xd6   :  { %451 = vmatprep.mubr.msk.f32.mxu1 %vm208_vm1, %v156_v38 }
  0xd9   :  { %452 = vmatmul.mubr.msk.f32.gmra.mxu1 %vm208_vm1, %v157_v39 }
  0xda   :  { %454 = vmatprep.mubr.msk.f32.mxu1 %vm208_vm1, %v158_v40 }
  0xdd   :  { %455 = vmatmul.mubr.msk.f32.gmra.mxu1 %vm208_vm1, %v159_v41 }
 0x195   :  { %v447_v51 = vpop.f32.mrf.mxu0  ;;  %v450_v52 = vpop.f32.mrf.mxu1 }
 0x196   :  { %v305_v53 = vadd.f32 %v447_v51, %v176_v44  ;;  %v315_v4 = vadd.f32 %v450_v52, %v186_v49 }
 0x197   :  { %v299_v57 = vpop.f32.mrf.mxu0  ;;  %v309_v58 = vpop.f32.mrf.mxu1 }
 0x198   :  { %v300_v60 = vadd.f32 %v299_v57, %v171_v43  ;;  %v310_v61 = vadd.f32 %v309_v58, %v181_v48  ;;  %v347_v3 = vmul.f32 %v346_v54, %v305_v53  ;;  %v359_v16 = vmul.f32 %v358_v5, %v315_v4 }
 0x199   :  { %v453_v1 = vpop.f32.mrf.mxu1 }
 0x19a   :  { %v342_v6 = vmul.f32 %v341_v56, %v300_v60  ;;  %v353_v11 = vmul.f32 %v352_v62, %v310_v61  ;;  %v325_v18 = vadd.f32 %v453_v1, %v196_v7 }
 0x19b   :  { %v319_v8 = vpop.f32.mrf.mxu1 }
 0x19c   :  { %v348_v10 = vadd.f32 %v347_v3, %v342_v6  ;;  %v320_v12 = vadd.f32 %v319_v8, %v191_v63  ;;  %v371_v27 = vmul.f32 %v370_v14, %v325_v18 }
 0x19d   :  { %v456_v15 = vpop.f32.mrf.mxu1 }
 0x19e   :  { %v354_v17 = vadd.f32 %v353_v11, %v348_v10  ;;  %v365_v23 = vmul.f32 %v364_v9, %v320_v12  ;;  %v335_v29 = vadd.f32 %v456_v15, %v206_v26 }
 0x19f   :  { %v329_v21 = vpop.f32.mrf.mxu1 }
 0x1a0   :  { %v360_v22 = vadd.f32 %v359_v16, %v354_v17  ;;  %v330_v24 = vadd.f32 %v329_v21, %v201_v20  ;;  %v383_v33 = vmul.f32 %v382_v30, %v335_v29 }
 0x1a2   :  { %v366_v28 = vadd.f32 %v365_v23, %v360_v22  ;;  %v377_v31 = vmul.f32 %v376_v25, %v330_v24 }
 0x1a4   :  { %v372_v32 = vadd.f32 %v371_v27, %v366_v28 }
 0x1a6   :  { %v378_v34 = vadd.f32 %v377_v31, %v372_v32 }
 0x1a8   :  { %v384_v35 = vadd.f32 %v383_v33, %v378_v34 }
 0x1aa   :  { %385 = vst [vmem:[#allocation2] sm:$0xff] %v384_v35 }
 0x1ab   :  { %480 = shalt.err (!%p477_p4)
}
 0x1ac   :  { %395 = dma.vmem_to_hbm [thread:$0]  %s393_s12, 128, %s630_s5, [#allocation3]  }
 0x1ad   :  { %489 = dma.done.wait [#allocation3], 128  }
 0x1ae   :  { %490 = vsyncadd [#allocation3], 4294967168 }
 0x1af   :  { %399 = vsyncpa [#allocation3], 1 }

</bundles_post_ra>
